<compile_context>
chip_gen: v7x
topology: tpu7x:2x2x1
jax: 0.10.0
libtpu: 0.0.40
codegen_flags: <defaults>
</compile_context>

<pallas_src>
import jax
import jax.numpy as jnp
from jax.experimental import pallas as pl
from jax.experimental.pallas import tpu as pltpu


_LANE = 512                      # output last dim: large multiple of 128 -> unmasked stores
_TILE_BYTES = 4 * 1024 * 1024    # per-buffer tile budget (4 MiB); x4 when double-buffered in+out
_SMALL_ROWS = 256                # below this, a single full-extent block is cheapest
_VMEM_LIMIT = 32 * 1024 * 1024   # explicit scoped-VMEM limit (safe on v5e/v6e/v7x)


def _swish_kernel(x_ref, o_ref):
    # Compute in f32 for accuracy (also the only correct path on v5e: no bf16
    # VPU/EUP).  One EUP transcendental per element; the kernel stays HBM-bound
    # on all generations, so the math is not worth micro-optimizing:
    #   sigmoid(x) = 0.5 * (tanh(x / 2) + 1)
    xf = x_ref[...].astype(jnp.float32)
    sig = 0.5 * (jnp.tanh(0.5 * xf) + 1.0)
    o_ref[...] = (xf * sig).astype(o_ref.dtype)


def _round_up(v, m):
    return ((v + m - 1) // m) * m


def _choose_tiling(rows, itemsize):
    """Pick (tile_rows, grid_n) for a (rows, _LANE) slab."""
    # Dtype-aware sublane multiple: packed dtypes need 16/32-row alignment to
    # keep loads/stores unmasked on the packed layout.
    sublane = {4: 8, 2: 16, 1: 32}.get(itemsize, 8)
    # Max rows per tile at the fixed per-buffer byte budget (bf16 gets 2x rows
    # for the same VMEM footprint automatically).
    max_rows = max(sublane, _TILE_BYTES // (_LANE * itemsize))

    if rows <= _SMALL_ROWS:
        # Tiny slab: one full-extent block (legal even if rows % 8 != 0).
        return rows, 1

    # Target an even grid with at least 4 steps so both v7x TensorCores get
    # >=2 steps each (balanced + per-TC double buffering).
    grid_n = pl.cdiv(rows, max_rows)
    if grid_n % 2:
        grid_n += 1
    grid_n = max(grid_n, 4)

    # Round tile_rows UP so the trailing block is never a sliver.
    tile_rows = min(max_rows, _round_up(pl.cdiv(rows, grid_n), sublane))
    return tile_rows, pl.cdiv(rows, tile_rows)


def _swish_2d(x2d):
    """Run the Pallas kernel over a (rows, _LANE) slab."""
    rows = x2d.shape[0]
    tile_rows, grid_n = _choose_tiling(rows, jnp.dtype(x2d.dtype).itemsize)

    return pl.pallas_call(
        _swish_kernel,
        out_shape=jax.ShapeDtypeStruct((rows, _LANE), x2d.dtype),
        grid_spec=pltpu.PrefetchScalarGridSpec(
            num_scalar_prefetch=0,
            grid=(grid_n,),
            in_specs=[pl.BlockSpec((tile_rows, _LANE), lambda i: (i, 0))],
            out_specs=pl.BlockSpec((tile_rows, _LANE), lambda i: (i, 0)),
        ),
        compiler_params=pltpu.CompilerParams(
            dimension_semantics=("parallel",),
            vmem_limit_bytes=_VMEM_LIMIT,
        ),
    )(x2d)


def swish(x):
    """Swish (x * sigmoid(x)) applied elementwise to an array of any shape."""
    orig_shape = x.shape
    n = x.size
    x_flat = jnp.reshape(x, (-1,))

    n_main = (n // _LANE) * _LANE
    if n_main == 0:
        # < 512 elements: a kernel launch costs more than the math.
        return x * jax.nn.sigmoid(x)

    rows = n_main // _LANE
    out_main = _swish_2d(jnp.reshape(x_flat[:n_main], (rows, _LANE)))
    out_flat = jnp.reshape(out_main, (-1,))

    if n_main != n:
        # Ragged tail (< 512 elements): plain jnp, no full-array pad/slice.
        tail = x_flat[n_main:]
        out_flat = jnp.concatenate([out_flat, tail * jax.nn.sigmoid(tail)])

    return jnp.reshape(out_flat, orig_shape)


if __name__ == "__main__":
    key = jax.random.PRNGKey(0)

    # NCHW conv-activation-like input, as the module's forward implies.
    x = jax.random.normal(key, (2, 4, 16, 16), dtype=jnp.float32)
    y = jax.block_until_ready(swish(x))
    y_ref = x * jax.nn.sigmoid(x)
    assert y.shape == x.shape and y.dtype == x.dtype
    assert float(jnp.max(jnp.abs(y - y_ref))) < 1e-5

    # Larger shape exercising the multi-block (even, >=4-step) grid path, and
    # a ragged shape exercising the prefix-kernel + jnp-tail path.
    for i, shape in enumerate([(4, 8, 32, 32), (8, 16, 64, 64), (3, 5, 7, 11)]):
        xi = jax.random.normal(jax.random.PRNGKey(i + 1), shape, dtype=jnp.float32)
        yi = jax.block_until_ready(swish(xi))
        yi_ref = xi * jax.nn.sigmoid(xi)
        assert yi.shape == xi.shape and yi.dtype == xi.dtype
        assert float(jnp.max(jnp.abs(yi - yi_ref))) < 1e-5

    # bf16 path: exercises the dtype-aware sublane alignment / doubled rows.
    xb = jax.random.normal(jax.random.PRNGKey(7), (8, 16, 64, 64), dtype=jnp.float32)
    xb = xb.astype(jnp.bfloat16)
    yb = jax.block_until_ready(swish(xb))
    xbf = xb.astype(jnp.float32)
    yb_ref = (xbf * jax.nn.sigmoid(xbf)).astype(jnp.bfloat16)
    assert yb.shape == xb.shape and yb.dtype == xb.dtype
    assert float(jnp.max(jnp.abs(yb.astype(jnp.float32) - yb_ref.astype(jnp.float32)))) < 5e-2

    print("KERNEL_OK")
</pallas_src>

<mosaic_0001>
module attributes {stable_mosaic.version = 11 : i64} {
  func.func @_swish_kernel(%arg0: i32, %arg1: memref<4x512xf32, #tpu.memory_space<vmem>>, %arg2: memref<4x512xf32, #tpu.memory_space<vmem>>) attributes {dimension_semantics = [#tpu.dimension_semantics<parallel>], iteration_bounds = array<i64: 1>, scalar_prefetch = 0 : i64, scratch_operands = 0 : i64, tpu.core_type = #tpu.core_type<tc>, window_params = [{transform_indices = @transform_0, window_bounds = array<i64: 4, 512>}, {transform_indices = @transform_1, window_bounds = array<i64: 4, 512>}]} {
    %c0 = arith.constant 0 : index
    %c0_0 = arith.constant 0 : index
    %0 = vector.load %arg1[%c0, %c0_0] : memref<4x512xf32, #tpu.memory_space<vmem>>, vector<4x512xf32>
    %cst = arith.constant 5.000000e-01 : f32
    %1 = vector.broadcast %cst : f32 to vector<4x512xf32>
    %2 = arith.mulf %1, %0 : vector<4x512xf32>
    %3 = math.tanh %2 : vector<4x512xf32>
    %cst_1 = arith.constant 1.000000e+00 : f32
    %4 = vector.broadcast %cst_1 : f32 to vector<4x512xf32>
    %5 = arith.addf %3, %4 : vector<4x512xf32>
    %cst_2 = arith.constant 5.000000e-01 : f32
    %6 = vector.broadcast %cst_2 : f32 to vector<4x512xf32>
    %7 = arith.mulf %6, %5 : vector<4x512xf32>
    %8 = arith.mulf %0, %7 : vector<4x512xf32>
    %c0_3 = arith.constant 0 : index
    %c0_4 = arith.constant 0 : index
    %9 = vector.load %arg2[%c0_3, %c0_4] : memref<4x512xf32, #tpu.memory_space<vmem>>, vector<4x512xf32>
    tpu.vector_store %arg2[%c0_3, %c0_4], %8 {strides = array<i32>} : memref<4x512xf32, #tpu.memory_space<vmem>>, vector<4x512xf32>,
    return
  }
  func.func @transform_0(%arg0: i32) -> (i32, i32) {
    %c0_i32 = arith.constant 0 : i32
    %c0_i32_0 = arith.constant 0 : i32
    return %arg0, %c0_i32 : i32, i32
  }
  func.func @transform_1(%arg0: i32) -> (i32, i32) {
    %c0_i32 = arith.constant 0 : i32
    %c0_i32_0 = arith.constant 0 : i32
    return %arg0, %c0_i32 : i32, i32
  }
}

</mosaic_0001>

<bundles_post_ra>
// kernel: tpu_custom_call.1
= control target key start
LH: loop header
LB: loop body
LE: loop exit
PB: predicated region body
PF: predicated region fallthrough
CT: control target
= control target key end

     0   :  { %6 = vsyncpa [#allocation3], 0  ;;  %s140_s0 = inlined_call_operand.hbm [shape: f32[4,512], index: 0, kind: input, shape index: {}]   ;;  %s141_s1 = inlined_call_operand.hbm [shape: f32[4,512], index: 1, kind: output, shape index: {}]  }
   0x1   :  { %7 = vsyncpa [#allocation4], 0  ;;  %s104_s6 = smov [#allocation2]   ;;  %s56_s10 = scalar_lea.hbm %s140_s0, 256 }
   0x2   :  { %s14_s7 = sshll.u32 %s104_s6, 4  ;;  %p57_p0 = scmp.ne.s32.totalorder %s140_s0, %s56_s10  ;;  %s15_s7 = int_to_ptr.vmem [resolvable:$true] %s14_s7 }
   0x3   :  { %p60_p1 = scmp.lt.u32.totalorder %s56_s10, %s140_s0 }
   0x5   :  { %p62_p2 = pnand %p60_p1, %p57_p0 }
   0x7   :  { %65 = shalt.err (!%p62_p2)
}
   0x8   :  { %s66_s15 = scalar_lea.vmem %s15_s7, 256  ;;  %p71_p4 = scmp.lt.s32.totalorder %s15_s7, %s15_s7 }
   0x9   :  { %p67_p3 = scmp.ne.s32.totalorder %s15_s7, %s66_s15  ;;  %p72_p5 = scmp.lt.s32.totalorder %s66_s15, %s66_s15 }
   0xb   :  { %p73_p6 = por %p72_p5, %p71_p4 }
   0xd   :  { %p74_p7 = pnand %p73_p6, %p67_p3 }
   0xf   :  { %77 = shalt.err (!%p74_p7)
}
  0x10   :  { %17 = dma.hbm_to_vmem [thread:$0]  %s140_s0, 256, %s15_s7, [#allocation3]  }
  0x11   :  { %100 = dma.done.wait [#allocation3], 256  }
  0x12   :  { %101 = vsyncadd [#allocation3], 4294967040  ;;  %v21_v0 = vld [vmem:[#allocation2] sm:$0xff]  ;;  %v22_v1 = vld [vmem:[#allocation2 + $0x8] sm:$0xff]  ;;  %s105_s18 = smov [#allocation5]  }
  0x13   :  { %v23_v2 = vmul.f32 0.5, %v21_v0  ;;  %v24_v3 = vmul.f32 0.5, %v22_v1  ;;  %s41_s19 = sshll.u32 %s105_s18, 4  ;;  %s42_s19 = int_to_ptr.vmem [resolvable:$true] %s41_s19 }
  0x14   :  { %s78_s0 = scalar_lea.vmem %s42_s19, 256  ;;  %p83_p9 = scmp.lt.s32.totalorder %s42_s19, %s42_s19 }
  0x15   :  { %52 = vtanh.f32 %v23_v2  ;;  %p79_p8 = scmp.ne.s32.totalorder %s42_s19, %s78_s0  ;;  %p84_p10 = scmp.lt.s32.totalorder %s78_s0, %s78_s0 }
  0x16   :  { %54 = vtanh.f32 %v24_v3 }
  0x17   :  { %p85_p11 = por %p84_p10, %p83_p9 }
  0x19   :  { %p86_p12 = pnand %p85_p11, %p79_p8 }
  0x1f   :  { %v53_v4 = vpop.eup %52 }
  0x20   :  { %v55_v5 = vpop.eup %54  ;;  %v27_v6 = vadd.f32 1.0, %v53_v4 }
  0x21   :  { %v28_v7 = vadd.f32 1.0, %v55_v5 }
  0x22   :  { %v29_v8 = vmul.f32 0.5, %v27_v6 }
  0x23   :  { %v30_v9 = vmul.f32 0.5, %v28_v7 }
  0x24   :  { %v31_v10 = vmul.f32 %v29_v8, %v21_v0 }
  0x25   :  { %v32_v11 = vmul.f32 %v30_v9, %v22_v1 }
  0x26   :  { %33 = vst [vmem:[#allocation5] sm:$0xff] %v31_v10 }
  0x27   :  { %34 = vst [vmem:[#allocation5 + $0x8] sm:$0xff] %v32_v11 }
  0x28   :  { %89 = shalt.err (!%p86_p12)
}
  0x29   :  { %s90_s22 = scalar_lea.hbm %s141_s1, 256 }
  0x2a   :  { %p91_p13 = scmp.ne.s32.totalorder %s141_s1, %s90_s22  ;;  %p94_p0 = scmp.lt.u32.totalorder %s90_s22, %s141_s1 }
  0x2c   :  { %p96_p1 = pnand %p94_p0, %p91_p13 }
  0x2e   :  { %99 = shalt.err (!%p96_p1)
}
  0x2f   :  { %44 = dma.vmem_to_hbm [thread:$0]  %s42_s19, 256, %s141_s1, [#allocation4]  }
  0x30   :  { %102 = dma.done.wait [#allocation4], 256  }
  0x31   :  { %103 = vsyncadd [#allocation4], 4294967040 }
  0x32   :  { %48 = vsyncpa [#allocation3], 1 }
  0x33   :  { %49 = vsyncpa [#allocation4], 1 }

</bundles_post_ra>
